<compile_context>
chip_gen: v6e
topology: v6e:2x2x1
jax: 0.10.0
libtpu: 0.0.40
codegen_flags: <defaults>
</compile_context>

<pallas_src>
import numpy as np
import jax
import jax.numpy as jnp
from jax.experimental import pallas as pl
from jax.experimental.pallas import tpu as pltpu


# ------------------------------- Pallas kernel -------------------------------

def qgnn_kernel(mlp_ref, psi_ref, m_ref, out_ref):
    """One batch tile of graphs.

    mlp_ref : SMEM (16,)  [w1(3), b1(3), w2(3), b2, pad...]
    psi_ref : VMEM (Bblk, D)  real product-state amplitudes after RY encoding
    m_ref   : VMEM (D, D)     folded observable M = P Uw^T Z Uw P
    out_ref : VMEM (Bblk, 1)  per-graph scalar output of post_mlp
    """
    psi = psi_ref[...]                                            # (Bblk, D)

    # <Z..Z> expectation of the RY/CZ circuit: expv_b = psi_b @ M @ psi_b^T.
    # (real-amplitude assumption: valid for the RY/CZ family simulated here)
    mpsi = jnp.dot(psi, m_ref[...],
                   preferred_element_type=jnp.float32)            # MXU, (Bblk, D)
    expv = jnp.sum(psi * mpsi, axis=1, keepdims=True)             # (Bblk, 1)

    # post_mlp: Dropout(identity, eval) -> Linear(1,3) -> SiLU -> Linear(3,1)
    acc = jnp.zeros_like(expv)
    for j in range(3):                                            # static unroll
        h = expv * mlp_ref[j] + mlp_ref[3 + j]
        h = h * jax.nn.sigmoid(h)                                 # SiLU
        acc = acc + h * mlp_ref[6 + j]
    out_ref[...] = acc + mlp_ref[9]


def qgnn_pallas_forward(psi0, m_mat, mlp, *, block_b=8):
    B, D = psi0.shape
    assert B % block_b == 0
    out = pl.pallas_call(
        qgnn_kernel,
        out_shape=jax.ShapeDtypeStruct((B, 1), jnp.float32),
        grid=(B // block_b,),
        in_specs=[
            pl.BlockSpec(memory_space=pltpu.MemorySpace.SMEM),      # mlp params
            pl.BlockSpec((block_b, D), lambda i: (i, 0)),           # psi0 tile
            pl.BlockSpec((D, D), lambda i: (0, 0)),                 # M (shared)
        ],
        out_specs=pl.BlockSpec((block_b, 1), lambda i: (i, 0)),
        compiler_params=pltpu.CompilerParams(
            dimension_semantics=("parallel",)),                     # megacore on v7x
    )(mlp, psi0, m_mat)
    return out.reshape(-1)                                          # x.view(-1)


# ---------------------------- host-side parameters ----------------------------

def _ry(angle):
    c, s = np.cos(angle / 2.0), np.sin(angle / 2.0)
    return np.array([[c, -s], [s, c]], dtype=np.float64)


def _basis_tables(num_qubits, edges):
    D = 2 ** num_qubits
    b = np.arange(D)
    bits = ((b[:, None] >> np.arange(num_qubits)[None, :]) & 1).astype(np.float64)
    phase = np.ones((D,), np.float64)
    for (a, c) in edges:                       # CZ: (-1)^(b_a * b_c)
        phase *= 1.0 - 2.0 * (bits[:, a] * bits[:, c])
    zdiag = 1.0 - 2.0 * (bits.sum(axis=1) % 2)
    return bits, phase, zdiag


def build_qgnn_params(num_qubits, edges, key):
    """Deterministic parameter init; folds circuit diagonals into one matrix."""
    k1, k2, k3, k4 = jax.random.split(key, 4)

    # Surrogate for the 11 conv + 1 entanglement circuit weights.
    w_circ = 0.1 * np.arange(1, num_qubits + 1, dtype=np.float64)
    uw = np.array([[1.0]])
    for i in reversed(range(num_qubits)):      # qubit 0 = LSB
        uw = np.kron(uw, _ry(w_circ[i]))

    _, phase, zdiag = _basis_tables(num_qubits, edges)
    # Folded observable:  expv = psi0^T (P Uw^T Z Uw P) psi0
    m_mat = phase[:, None] * (uw.T @ (zdiag[:, None] * uw)) * phase[None, :]

    # post_mlp: Linear(1,3) and Linear(3,1) (torch weight layout (out,in)).
    w1 = np.asarray(jax.random.normal(k1, (3, 1), jnp.float32)) * 0.5
    b1 = np.asarray(jax.random.normal(k2, (3,), jnp.float32)) * 0.1
    w2 = np.asarray(jax.random.normal(k3, (1, 3), jnp.float32)) * 0.5
    b2 = np.asarray(jax.random.normal(k4, (1,), jnp.float32)) * 0.1

    mlp = np.zeros((16,), np.float32)
    mlp[0:3] = w1.reshape(3)
    mlp[3:6] = b1
    mlp[6:9] = w2.reshape(3)
    mlp[9] = b2[0]

    return dict(M=jnp.asarray(m_mat, jnp.float32),
                mlp=jnp.asarray(mlp),
                uw=uw, phase=phase, zdiag=zdiag,
                w1=w1, b1=b1, w2=w2, b2=b2)


# ----------------------- jitted graph glue + full forward ---------------------

def make_qgnn_forward(num_qubits, edges, params, *, block_b=8):
    """Returns a jitted forward over a batch of graphs (x, h) -> (B,) outputs."""
    D = 2 ** num_qubits
    edges_a = jnp.asarray([a for a, _ in edges], jnp.int32)
    edges_b = jnp.asarray([b for _, b in edges], jnp.int32)
    b_idx = np.arange(D)
    bits = jnp.asarray(
        ((b_idx[:, None] >> np.arange(num_qubits)[None, :]) & 1).astype(np.float32))
    m_mat, mlp = params["M"], params["mlp"]

    @jax.jit
    def forward(x, h):
        # graph glue: cosine similarity across each edge (get_similarity)
        va, vb = x[:, edges_a, :], x[:, edges_b, :]                       # (B,E,F)
        sims = jnp.sum(va * vb, -1) / (
            jnp.linalg.norm(va, axis=-1) * jnp.linalg.norm(vb, axis=-1) + 1e-8)

        # TODO(synk): exact per-gate parameter binding of the qiskit circuit is
        # not reproducible; fold graph.x, graph.h and edge similarities into one
        # RY encoding angle per qubit.
        theta = x.sum(-1) + h.sum(-1)                                     # (B,N)
        theta = theta.at[:, edges_a].add(sims)
        theta = theta.at[:, edges_b].add(sims)

        # RY product-state amplitudes, lane-dense on the basis axis D.
        c = jnp.cos(0.5 * theta)
        s = jnp.sin(0.5 * theta)
        amps = c[:, None, :] * (1.0 - bits)[None] + s[:, None, :] * bits[None]
        psi0 = jnp.prod(amps, axis=-1)                                    # (B,D)

        return qgnn_pallas_forward(psi0, m_mat, mlp, block_b=block_b)

    return forward


# ----------------------------- numpy reference --------------------------------

def reference_from_psi0(psi0, params):
    """Step-by-step statevector reference (validates the fold into M)."""
    psi0 = np.asarray(psi0, np.float64)
    psi1 = psi0 * params["phase"][None, :]                # CZ entanglement
    psi2 = psi1 @ params["uw"].T                          # weight RY layer
    expv = np.sum(params["zdiag"][None, :] * psi2 * psi2, axis=1, keepdims=True)
    h = expv @ params["w1"].astype(np.float64).T + params["b1"][None, :]
    h = h * (1.0 / (1.0 + np.exp(-h)))                    # SiLU
    y = h @ params["w2"].astype(np.float64).T + params["b2"][None, :]
    return y.reshape(-1)


if __name__ == "__main__":
    num_qubits = 4            # D = 16 basis states
    feat = 3
    batch = 16                # 16 graphs per pallas_call, 2 grid steps of 8
    edges = [(0, 1), (1, 2), (2, 3), (3, 0)]

    key = jax.random.PRNGKey(0)
    kx, kh, kp = jax.random.split(key, 3)
    graph_x = jax.random.normal(kx, (batch, num_qubits, feat), jnp.float32)
    graph_h = jax.random.normal(kh, (batch, num_qubits, feat), jnp.float32)
    params = build_qgnn_params(num_qubits, edges, kp)

    forward = make_qgnn_forward(num_qubits, edges, params, block_b=8)
    out = jax.block_until_ready(forward(graph_x, graph_h))

    # correctness: recompute psi0 the same way and run the unfused reference.
    edges_a = np.array([a for a, _ in edges])
    edges_b = np.array([b for _, b in edges])
    x_np = np.asarray(graph_x, np.float64)
    h_np = np.asarray(graph_h, np.float64)
    va, vb = x_np[:, edges_a, :], x_np[:, edges_b, :]
    sims = np.sum(va * vb, -1) / (np.linalg.norm(va, axis=-1)
                                  * np.linalg.norm(vb, axis=-1) + 1e-8)
    theta = x_np.sum(-1) + h_np.sum(-1)
    np.add.at(theta, (slice(None), edges_a), sims)
    np.add.at(theta, (slice(None), edges_b), sims)
    D = 2 ** num_qubits
    bits_np = ((np.arange(D)[:, None] >> np.arange(num_qubits)[None, :]) & 1)
    amps = (np.cos(0.5 * theta)[:, None, :] * (1 - bits_np)[None]
            + np.sin(0.5 * theta)[:, None, :] * bits_np[None])
    psi0_ref = np.prod(amps, axis=-1)
    ref = reference_from_psi0(psi0_ref, params)

    ok = bool(jnp.all(jnp.isfinite(out))) and out.shape == (batch,)
    ok = ok and np.allclose(np.asarray(out), ref, rtol=5e-2, atol=5e-2)
    assert ok, (np.asarray(out), ref)
    print("KERNEL_OK")
</pallas_src>

<mosaic_0001>
module attributes {stable_mosaic.version = 11 : i64} {
  func.func @qgnn_kernel(%arg0: i32, %arg1: memref<16xf32, #tpu.memory_space<smem>>, %arg2: memref<8x16xf32, #tpu.memory_space<vmem>>, %arg3: memref<16x16xf32, #tpu.memory_space<vmem>>, %arg4: memref<8x1xf32, #tpu.memory_space<vmem>>) attributes {dimension_semantics = [#tpu.dimension_semantics<parallel>], iteration_bounds = array<i64: 2>, scalar_prefetch = 0 : i64, scratch_operands = 0 : i64, tpu.core_type = #tpu.core_type<tc>, window_params = [{transform_indices = @transform_0, window_bounds = array<i64: 16>}, {transform_indices = @transform_1, window_bounds = array<i64: 8, 16>}, {pipeline_mode = #tpu.pipeline_mode<synchronous>, transform_indices = @transform_2, window_bounds = array<i64: 16, 16>}, {transform_indices = @transform_3, window_bounds = array<i64: 8, 1>}]} {
    %c0 = arith.constant 0 : index
    %c0_0 = arith.constant 0 : index
    %0 = vector.load %arg2[%c0, %c0_0] : memref<8x16xf32, #tpu.memory_space<vmem>>, vector<8x16xf32>
    %c0_1 = arith.constant 0 : index
    %c0_2 = arith.constant 0 : index
    %1 = vector.load %arg3[%c0_1, %c0_2] : memref<16x16xf32, #tpu.memory_space<vmem>>, vector<16x16xf32>
    %cst = arith.constant dense<0.000000e+00> : vector<8x16xf32>
    %2 = tpu.matmul %0, %1, %cst {dimension_numbers = #tpu.dot_dimension_numbers<[1], [0], [0], [1], [0, 0, 1, 1], [], []>} : vector<8x16xf32>, vector<16x16xf32>, vector<8x16xf32> -> vector<8x16xf32>
    %3 = arith.mulf %0, %2 : vector<8x16xf32>
    %cst_3 = arith.constant dense<0.000000e+00> : vector<8xf32>
    %4 = vector.multi_reduction <add>, %3, %cst_3 [1] : vector<8x16xf32> to vector<8xf32>
    %5 = vector.shape_cast %4 : vector<8xf32> to vector<8x1xf32>
    %cst_4 = arith.constant 0.000000e+00 : f32
    %6 = vector.broadcast %cst_4 : f32 to vector<8x1xf32>
    %c0_5 = arith.constant 0 : index
    %7 = memref.load %arg1[%c0_5] : memref<16xf32, #tpu.memory_space<smem>>
    %8 = vector.broadcast %7 : f32 to vector<8x1xf32>
    %9 = arith.mulf %5, %8 : vector<8x1xf32>
    %c3 = arith.constant 3 : index
    %10 = memref.load %arg1[%c3] : memref<16xf32, #tpu.memory_space<smem>>
    %11 = vector.broadcast %10 : f32 to vector<8x1xf32>
    %12 = arith.addf %9, %11 : vector<8x1xf32>
    %13 = arith.negf %12 : vector<8x1xf32>
    %14 = math.exp %13 : vector<8x1xf32>
    %cst_6 = arith.constant 1.000000e+00 : f32
    %15 = vector.broadcast %cst_6 : f32 to vector<8x1xf32>
    %16 = arith.addf %15, %14 : vector<8x1xf32>
    %17 = arith.divf %15, %16 : vector<8x1xf32>
    %18 = arith.mulf %12, %17 : vector<8x1xf32>
    %c6 = arith.constant 6 : index
    %19 = memref.load %arg1[%c6] : memref<16xf32, #tpu.memory_space<smem>>
    %20 = vector.broadcast %19 : f32 to vector<8x1xf32>
    %21 = arith.mulf %18, %20 : vector<8x1xf32>
    %22 = arith.addf %6, %21 : vector<8x1xf32>
    %c1 = arith.constant 1 : index
    %23 = memref.load %arg1[%c1] : memref<16xf32, #tpu.memory_space<smem>>
    %24 = vector.broadcast %23 : f32 to vector<8x1xf32>
    %25 = arith.mulf %5, %24 : vector<8x1xf32>
    %c4 = arith.constant 4 : index
    %26 = memref.load %arg1[%c4] : memref<16xf32, #tpu.memory_space<smem>>
    %27 = vector.broadcast %26 : f32 to vector<8x1xf32>
    %28 = arith.addf %25, %27 : vector<8x1xf32>
    %29 = arith.negf %28 : vector<8x1xf32>
    %30 = math.exp %29 : vector<8x1xf32>
    %cst_7 = arith.constant 1.000000e+00 : f32
    %31 = vector.broadcast %cst_7 : f32 to vector<8x1xf32>
    %32 = arith.addf %31, %30 : vector<8x1xf32>
    %33 = arith.divf %31, %32 : vector<8x1xf32>
    %34 = arith.mulf %28, %33 : vector<8x1xf32>
    %c7 = arith.constant 7 : index
    %35 = memref.load %arg1[%c7] : memref<16xf32, #tpu.memory_space<smem>>
    %36 = vector.broadcast %35 : f32 to vector<8x1xf32>
    %37 = arith.mulf %34, %36 : vector<8x1xf32>
    %38 = arith.addf %22, %37 : vector<8x1xf32>
    %c2 = arith.constant 2 : index
    %39 = memref.load %arg1[%c2] : memref<16xf32, #tpu.memory_space<smem>>
    %40 = vector.broadcast %39 : f32 to vector<8x1xf32>
    %41 = arith.mulf %5, %40 : vector<8x1xf32>
    %c5 = arith.constant 5 : index
    %42 = memref.load %arg1[%c5] : memref<16xf32, #tpu.memory_space<smem>>
    %43 = vector.broadcast %42 : f32 to vector<8x1xf32>
    %44 = arith.addf %41, %43 : vector<8x1xf32>
    %45 = arith.negf %44 : vector<8x1xf32>
    %46 = math.exp %45 : vector<8x1xf32>
    %cst_8 = arith.constant 1.000000e+00 : f32
    %47 = vector.broadcast %cst_8 : f32 to vector<8x1xf32>
    %48 = arith.addf %47, %46 : vector<8x1xf32>
    %49 = arith.divf %47, %48 : vector<8x1xf32>
    %50 = arith.mulf %44, %49 : vector<8x1xf32>
    %c8 = arith.constant 8 : index
    %51 = memref.load %arg1[%c8] : memref<16xf32, #tpu.memory_space<smem>>
    %52 = vector.broadcast %51 : f32 to vector<8x1xf32>
    %53 = arith.mulf %50, %52 : vector<8x1xf32>
    %54 = arith.addf %38, %53 : vector<8x1xf32>
    %c9 = arith.constant 9 : index
    %55 = memref.load %arg1[%c9] : memref<16xf32, #tpu.memory_space<smem>>
    %56 = vector.broadcast %55 : f32 to vector<8x1xf32>
    %57 = arith.addf %54, %56 : vector<8x1xf32>
    %c0_9 = arith.constant 0 : index
    %c0_10 = arith.constant 0 : index
    %58 = vector.load %arg4[%c0_9, %c0_10] : memref<8x1xf32, #tpu.memory_space<vmem>>, vector<8x1xf32>
    tpu.vector_store %arg4[%c0_9, %c0_10], %57 {strides = array<i32>} : memref<8x1xf32, #tpu.memory_space<vmem>>, vector<8x1xf32>,
    return
  }
  func.func @transform_0(%arg0: i32) -> i32 {
    %c0_i32 = arith.constant 0 : i32
    %c0_i32_0 = arith.constant 0 : i32
    return %c0_i32 : i32
  }
  func.func @transform_1(%arg0: i32) -> (i32, i32) {
    %c0_i32 = arith.constant 0 : i32
    %c0_i32_0 = arith.constant 0 : i32
    return %arg0, %c0_i32 : i32, i32
  }
  func.func @transform_2(%arg0: i32) -> (i32, i32) {
    %c0_i32 = arith.constant 0 : i32
    %c0_i32_0 = arith.constant 0 : i32
    %c0_i32_1 = arith.constant 0 : i32
    return %c0_i32, %c0_i32_0 : i32, i32
  }
  func.func @transform_3(%arg0: i32) -> (i32, i32) {
    %c0_i32 = arith.constant 0 : i32
    %c0_i32_0 = arith.constant 0 : i32
    return %arg0, %c0_i32 : i32, i32
  }
}

</mosaic_0001>

<bundles_post_ra>
// kernel: forward.1
= control target key start
LH: loop header
LB: loop body
LE: loop exit
PB: predicated region body
PF: predicated region fallthrough
CT: control target
= control target key end

     0   :  { %8 = vsyncpa [#allocation3], 0  ;;  %s499_s12 = smov 0   ;;  %s551_s0 = inlined_call_operand.vmem [shape: f32[16], index: 0, kind: input, shape index: {}]   ;;  %s552_s1 = inlined_call_operand.vmem [shape: f32[16,16], index: 1, kind: input, shape index: {}]   ;;  %s553_s2 = inlined_call_operand.vmem [shape: f32[16,16], index: 2, kind: input, shape index: {}]   ;;  %s554_s3 = inlined_call_operand.vmem [shape: f32[16,1], index: 3, kind: output, shape index: {}]  }
   0x1 LB: > { %s505_s13 = sadd.s32 4294967295, %s474_s12   ;;  %p384_p0 = scmp.ge.s32.totalorder %s474_s12, 1  ;;  %s474_s12 = sphi %s499_s12, %s14_s12  }
   0x2   : > { %p113_p1 = scmp.lt.s32.totalorder %s474_s12, 3  ;;  %s126_s16 = sshll.u32 %s551_s0, 4  ;;  %s127_s16 = int_to_ptr.vmem [resolvable:$true] %s126_s16 }
   0x3   : > { %p424_p3 = scmp.eq.s32.totalorder %s505_s13, 0  ;;  %s449_s18 = scalar_lea.vmem %s127_s16, 16 }
   0x4   : > { %p512_p2 = pnand %p384_p0, %p113_p1  ;;  %p450_p6 = scmp.ne.s32.totalorder %s127_s16, %s449_s18 }
   0x5   : > { %p457_p10 = scmp.lt.s32.totalorder %s127_s16, %s127_s16  ;;  %p458_p11 = scmp.lt.s32.totalorder %s449_s18, %s449_s18 }
   0x6   : > { %p420_p4 = pneg %p512_p2 }
   0x7   : > { %p459_p12 = por %p458_p11, %p457_p10 }
   0x8   : > { %p421_p5 = pnand %p424_p3, %p420_p4 }
   0xa   : > { %p451_p7 = pneg %p421_p5 }
   0xc   : > { %p452_p8 = pnand %p451_p7, %p450_p6 }
   0xe   : > { %p453_p9 = pneg %p452_p8 }
  0x10   : > { %p460_p13 = pnand %p459_p12, %p453_p9 }
  0x12   : > { %463 = shalt.err (!%p460_p13)
}
  0x13   : > { %s476_s19 = smov [#allocation2]   ;;  %149 = sbr.rel (%p512_p2) target bundleno = 415 (0x19f), region = 32 }
  0x14   : > { %423 = dma.vmem_to_smem (!%p421_p5), %s127_s16, 16, %s476_s19, [#allocation3]  }
  0x18   : > { %469 = dma.done.wait (%p424_p3), [#allocation3], 16  }
  0x19   : > { %471 = vsyncadd (%p424_p3), [#allocation3], 4294967280 }
  0x1a   : > { %155 = sfence }
  0x1b   : > { %v182_v0 = vld [vmem:[%s553_s2 + $0x8] sm:$0xff]  ;;  %p172_p0 = scmp.lt.s32.totalorder %s505_s13, 1  ;;  %v477_v1 = vmov 0.0   ;;  %v181_v2 = vld [vmem:[%s553_s2] sm:$0xff]  ;;  %vm478_vm0 = vmmov 0   ;;  %vm183_vm1 = vcmask 130048  }
  0x1c   : > { %409 = vmatprep.subr.mxu0 %v477_v1  ;;  %413 = vmatprep.mubr.msk.f32.mxu0 %vm478_vm0, %v477_v1  ;;  %s261_s28 = sld [smem:[#allocation2]]  ;;  %vm315_vm2 = vcmask 7168  }
  0x1d   : > { %410 = vmatpush3.msra.mxu0 %v182_v0  ;;  %s557_s13 = smov (!%p172_p0, %s505_s13), 1  ;;  %s395_s29 = sld [smem:[#allocation2 + $0x1]] }
  0x1e   : > { %411 = vmatprep.subr.mxu0 %v477_v1  ;;  %s389_s24 = sshll.u32 %s557_s13, 3  ;;  %s392_s30 = sld [smem:[#allocation2 + $0x3]] }
  0x1f   : > { %412 = vmatpush3.msra.mxu0 %v181_v2  ;;  %s175_s27 = scalar_lea.vmem %s552_s1, %s389_s24  ;;  %s399_s4 = sld [smem:[#allocation2 + $0x2]] }
  0x20   : > { %v180_v3 = vld [vmem:[%s175_s27] sm:$0xff]  ;;  %s396_s5 = sld [smem:[#allocation2 + $0x4]]  ;;  %s179_s15 = scalar_lea.vmem %s554_s3, %s389_s24 }
  0x21   : > { %414 = vmatmul.mubr.msk.f32.vlgmr.msra.gmra.mxu0 %vm183_vm1, %v180_v3  ;;  %s400_s6 = sld [smem:[#allocation2 + $0x5]] }
  0x22   : > { %v262_v8 = vstv %s261_s28  ;;  %s394_s7 = sld [smem:[#allocation2 + $0x6]] }
  0x23   : > { %v279_v9 = vstv %s395_s29  ;;  %s398_s8 = sld [smem:[#allocation2 + $0x7]] }
  0x24   : > { %v265_v12 = vstv %s392_s30  ;;  %s402_s9 = sld [smem:[#allocation2 + $0x8]] }
  0x25   : > { %v296_v10 = vstv %s399_s4  ;;  %s403_s10 = sld [smem:[#allocation2 + $0x9]] }
  0x26   : > { %v282_v13 = vstv %s396_s5 }
  0x27   : > { %v299_v14 = vstv %s400_s6 }
  0x28   : > { %v275_v31 = vstv %s394_s7 }
  0x29   : > { %v292_v34 = vstv %s398_s8 }
  0x2a   : > { %v309_v39 = vstv %s402_s9 }
  0x2b   : > { %v313_v43 = vstv %s403_s10 }
  0xe1   : > { %v253_v4 = vpop.f32.mrf.mxu0 }
  0xe2   : > { %v257_v5 = vmul.f32 %v253_v4, %v180_v3 }
  0xe3   : > { %v415_v6 = vpop.f32.mrf.mxu0 }
  0xe4   : > { %v258_v7 = vsel %vm183_vm1, %v257_v5, 0.0 }
  0xe5   : > { %259 = vadd.xlane.f32.xlu0 %v258_v7 }
 0x16e   : > { %v260_v11 = vpop.xlane.xlu0 %259 }
 0x16f   : > { %v263_v15 = vmul.f32 %v262_v8, %v260_v11  ;;  %v280_v16 = vmul.f32 %v279_v9, %v260_v11  ;;  %v297_v17 = vmul.f32 %v296_v10, %v260_v11 }
 0x171   : > { %v266_v18 = vadd.f32 %v265_v12, %v263_v15  ;;  %v283_v19 = vadd.f32 %v282_v13, %v280_v16  ;;  %v300_v20 = vadd.f32 %v299_v14, %v297_v17 }
 0x173   : > { %v393_v21 = vmul.f32 -1.442695, %v266_v18  ;;  %v397_v22 = vmul.f32 -1.442695, %v283_v19  ;;  %v401_v23 = vmul.f32 -1.442695, %v300_v20 }
 0x175   : > { %437 = vpow2.f32 %v393_v21 }
 0x176   : > { %439 = vpow2.f32 %v397_v22 }
 0x177   : > { %441 = vpow2.f32 %v401_v23 }
 0x182   : > { %v438_v24 = vpop.eup %437 }
 0x183   : > { %v440_v25 = vpop.eup %439  ;;  %v270_v26 = vadd.f32 1.0, %v438_v24 }
 0x184   : > { %v442_v27 = vpop.eup %441  ;;  %v287_v28 = vadd.f32 1.0, %v440_v25 }
 0x185   : > { %443 = vrcp.f32 %v270_v26  ;;  %v304_v29 = vadd.f32 1.0, %v442_v27 }
 0x186   : > { %445 = vrcp.f32 %v287_v28 }
 0x187   : > { %447 = vrcp.f32 %v304_v29 }
 0x192   : > { %v444_v30 = vpop.eup %443 }
 0x193   : > { %v446_v32 = vpop.eup %445  ;;  %v273_v33 = vmul.f32 %v444_v30, %v266_v18 }
 0x194   : > { %v448_v35 = vpop.eup %447  ;;  %v290_v36 = vmul.f32 %v446_v32, %v283_v19 }
 0x195   : > { %v276_v37 = vmul.f32 %v275_v31, %v273_v33  ;;  %v307_v38 = vmul.f32 %v448_v35, %v300_v20 }
 0x196   : > { %v293_v40 = vmul.f32 %v292_v34, %v290_v36 }
 0x197   : > { %v310_v42 = vmul.f32 %v309_v39, %v307_v38 }
 0x198   : > { %v294_v41 = vadd.f32 %v293_v40, %v276_v37 }
 0x19a   : > { %v311_v44 = vadd.f32 %v310_v42, %v294_v41 }
 0x19c   : > { %v314_v45 = vadd.f32 %v313_v43, %v311_v44 }
 0x19e   : > { %316 = vst.msk [vmem:[%s179_s15] sm:$0xff] %vm315_vm2, %v314_v45 }
 0x19f PF: > { %s14_s12 = sadd.s32 1, %s474_s12  }
 0x1a0   : > { %p11_p1 = scmp.ge.s32.totalorder %s14_s12, 4  }
 0x1a2   :  { %13 = sbr.rel (!%p11_p1) target bundleno = 1 (0x1), region = 67 }
 0x1a7   :  { %336 = vsyncpa [#allocation3], 1 }
 0x1a8   :  { %338 = vsyncpa [#allocation3 + $0x1], 1 }

</bundles_post_ra>
